<compile_context>
chip_gen: v7x
topology: tpu7x:2x2x1
jax: 0.10.0
libtpu: 0.0.40
codegen_flags: <defaults>
</compile_context>

<pallas_src>
import jax
import jax.numpy as jnp
from jax import lax
from jax.experimental import pallas as pl
from jax.experimental.pallas import tpu as pltpu

NUM_CLASSES = 8  # Binary() hard-codes F.one_hot(..., num_classes=8)


def _pick_tb(B):
    """Batch tile: multiple of 8 dividing B (capped), else whole-array block."""
    if B % 8 != 0:
        return B
    tb = min(B, 512)
    while B % tb != 0:
        tb -= 8
    return tb


# -----------------------------------------------------------------------------
# Fused kernel (one grid step = one batch tile):
#   out[0, h]  = CrossEntropy(activity[h], target) + Binary(activity[h], target)
#   out[0, H]  = mean_i CosineEmbeddingLoss(player[i], player[i+1], +1)
#              + mean_i L1Loss(player[0], player[i+1])
# All sums are accumulated into the resident (1, H+1) output block.
# -----------------------------------------------------------------------------
def _make_fused_kernel(H, L, B, C, D, TB):
    inv_B = 1.0 / B
    inv_BD = 1.0 / (B * D)
    inv_pairs = 1.0 / (L - 1)
    eps2 = 1e-16  # ~ (1e-8)^2 : per-norm clamp (see correctness note below)

    def kernel(*refs):
        tgt_ref = refs[0]                       # [TB, 1] int32
        act_refs = refs[1:1 + H]                # H x [TB, C]
        ply_refs = refs[1 + H:1 + H + L]        # L x [TB, D]
        out_ref = refs[1 + H + L]               # [1, H+1] f32 (resident accumulator)

        step = pl.program_id(0)

        @pl.when(step == 0)
        def _init():
            out_ref[...] = jnp.zeros_like(out_ref)

        # ---------------- activity heads: CE + Binary (dice, p=2) -------------
        tgt = tgt_ref[...]                                            # [TB, 1]
        cls = lax.broadcasted_iota(jnp.int32, (TB, C), 1)             # class id
        onehot = (cls == tgt).astype(jnp.float32)                     # [TB, C]

        row_losses = []
        for h in range(H):
            x = act_refs[h][...].astype(jnp.float32)                  # [TB, C]
            # stable log-sum-exp over the class axis
            m = jnp.max(x, axis=-1, keepdims=True)
            lse = jnp.log(jnp.sum(jnp.exp(x - m), axis=-1, keepdims=True)) + m
            tgt_logit = jnp.sum(onehot * x, axis=-1, keepdims=True)
            ce_row = lse - tgt_logit                                  # [TB, 1]
            # dice-style binary loss (onehot**2 == onehot)
            p = jax.nn.sigmoid(x)
            d = p - onehot
            num = jnp.sum(d * d, axis=-1, keepdims=True)
            den = jnp.sum(p * p + onehot, axis=-1, keepdims=True)     # >= 1
            row_losses.append(ce_row + num / den)                     # exact divide

        # ------------- cosine-embedding + L1, vector partial accumulators -----
        xs = [r[...].astype(jnp.float32) for r in ply_refs]           # L x [TB, D]
        # one inverse norm per level (rsqrt on EUP); eps clamps each norm at
        # ~1e-8 (slightly different from PyTorch's max(na*nb, eps) for
        # degenerate all-zero rows only).
        inv_norm = [lax.rsqrt(jnp.maximum(jnp.sum(v * v, axis=-1, keepdims=True),
                                          jnp.float32(eps2)))
                    for v in xs]                                      # L x [TB, 1]
        x0 = xs[0]
        cos_acc = jnp.zeros((TB, 1), jnp.float32)
        l1_acc = jnp.zeros((TB, D), jnp.float32)
        for i in range(L - 1):                                        # static unroll
            a, b = xs[i], xs[i + 1]
            dot = jnp.sum(a * b, axis=-1, keepdims=True)              # [TB, 1]
            cos_acc = cos_acc + (1.0 - dot * inv_norm[i] * inv_norm[i + 1])
            l1_acc = l1_acc + jnp.abs(x0 - b)
        l1_row = jnp.sum(l1_acc, axis=-1, keepdims=True)              # [TB, 1]
        last_row = (cos_acc * jnp.float32(inv_B)
                    + l1_row * jnp.float32(inv_BD)) * jnp.float32(inv_pairs)

        # ------------- one segmented reduce for everything ---------------------
        # slab[:, h] = per-row head-h loss / B,  slab[:, H] = per-row cos/L1 part
        col = lax.broadcasted_iota(jnp.int32, (TB, H + 1), 1)
        slab = jnp.zeros((TB, H + 1), jnp.float32)
        for h in range(H):
            slab = jnp.where(col == h, row_losses[h] * jnp.float32(inv_B), slab)
        slab = jnp.where(col == H, last_row, slab)
        partial = jnp.sum(slab, axis=0, keepdims=True)                # [1, H+1]

        out_ref[...] = out_ref[...] + partial

    return kernel


# -----------------------------------------------------------------------------
# ActivityCriterion forward: single pallas_call, no wrapper relayouts,
# batch-tiled grid, single (1, H+1) readback.
# -----------------------------------------------------------------------------
def activity_criterion(outputs, target):
    activity = list(outputs['activity'])   # H x [B, C] logits (native dtype)
    players = list(outputs['cos_boxes'])   # L x [B, D] features (native dtype)
    H = len(activity)
    L = len(players)
    B, C = activity[0].shape
    assert C == NUM_CLASSES
    D = players[0].shape[-1]

    tgt2d = target.astype(jnp.int32).reshape(B, 1)   # free reshape, no tiling

    TB = _pick_tb(B)
    nb = B // TB

    kernel = _make_fused_kernel(H=H, L=L, B=B, C=C, D=D, TB=TB)

    in_specs = ([pl.BlockSpec((TB, 1), lambda b: (b, 0))]
                + [pl.BlockSpec((TB, C), lambda b: (b, 0)) for _ in range(H)]
                + [pl.BlockSpec((TB, D), lambda b: (b, 0)) for _ in range(L)])
    out_specs = pl.BlockSpec((1, H + 1), lambda b: (0, 0))

    out = pl.pallas_call(
        kernel,
        out_shape=jax.ShapeDtypeStruct((1, H + 1), jnp.float32),
        grid=(nb,),
        in_specs=in_specs,
        out_specs=out_specs,
        compiler_params=pltpu.CompilerParams(
            # batch axis is a reduction into the resident output block
            dimension_semantics=("arbitrary",)),
    )(tgt2d, *activity, *players)

    loss_dict = {}
    for i in range(H):
        loss_dict['activity_' + str(i)] = out[0, i]
    loss_dict['cosine'] = out[0, H]
    return loss_dict


# -----------------------------------------------------------------------------
# Pure-JAX reference (sanity check)
# -----------------------------------------------------------------------------
def _reference(outputs, target):
    def ce_plus_binary(logits, tgt):
        logits = logits.astype(jnp.float32)
        onehot = jax.nn.one_hot(tgt, NUM_CLASSES, dtype=jnp.float32)
        logp = jax.nn.log_softmax(logits, axis=-1)
        ce = -jnp.mean(jnp.sum(onehot * logp, axis=-1))
        p = jax.nn.sigmoid(logits)
        num = jnp.sum((p - onehot) ** 2, axis=-1)
        den = jnp.sum(p ** 2 + onehot ** 2, axis=-1)
        return ce + jnp.mean(num / den)

    activity = outputs['activity']
    player = outputs['cos_boxes']
    d = {}
    for i in range(len(activity)):
        d['activity_' + str(i)] = ce_plus_binary(activity[i], target)
    L = len(player)
    cos_total, l1_total = 0.0, 0.0
    for i in range(L - 1):
        a, b = player[i].astype(jnp.float32), player[i + 1].astype(jnp.float32)
        dot = jnp.sum(a * b, axis=-1)
        na = jnp.sqrt(jnp.sum(a * a, axis=-1))
        nb = jnp.sqrt(jnp.sum(b * b, axis=-1))
        cos_total = cos_total + jnp.mean(1.0 - dot / jnp.maximum(na * nb, 1e-8))
        l1_total = l1_total + jnp.mean(jnp.abs(player[0].astype(jnp.float32) - b))
    d['cosine'] = (cos_total + l1_total) / (L - 1)
    return d


if __name__ == "__main__":
    key = jax.random.PRNGKey(0)
    B, C, D = 8, NUM_CLASSES, 32
    n_activity, n_players = 2, 3

    keys = jax.random.split(key, n_activity + n_players + 1)
    activity = [jax.random.normal(keys[i], (B, C), dtype=jnp.float32)
                for i in range(n_activity)]
    cos_boxes = [jax.random.normal(keys[n_activity + i], (B, D), dtype=jnp.float32)
                 for i in range(n_players)]
    target = jax.random.randint(keys[-1], (B,), 0, C, dtype=jnp.int32)

    outputs = {'activity': activity, 'cos_boxes': cos_boxes}

    loss_dict = jax.jit(activity_criterion)(outputs, target)
    loss_dict = jax.tree_util.tree_map(jax.block_until_ready, loss_dict)

    ref = _reference(outputs, target)
    for k in sorted(loss_dict):
        # Tolerance covers transcendental rounding differences (exp/sigmoid/
        # rsqrt) between the Pallas and XLA paths; divides are now exact.
        assert jnp.allclose(loss_dict[k], ref[k], rtol=1e-3, atol=1e-3), (
            f"mismatch for {k}: {loss_dict[k]} vs {ref[k]}")

    print("KERNEL_OK")
</pallas_src>

<mosaic_0001>
module attributes {stable_mosaic.version = 11 : i64} {
  func.func @kernel(%arg0: i32, %arg1: memref<8x1xi32, #tpu.memory_space<vmem>>, %arg2: memref<8x8xf32, #tpu.memory_space<vmem>>, %arg3: memref<8x8xf32, #tpu.memory_space<vmem>>, %arg4: memref<8x32xf32, #tpu.memory_space<vmem>>, %arg5: memref<8x32xf32, #tpu.memory_space<vmem>>, %arg6: memref<8x32xf32, #tpu.memory_space<vmem>>, %arg7: memref<1x3xf32, #tpu.memory_space<vmem>>) attributes {dimension_semantics = [#tpu.dimension_semantics<arbitrary>], iteration_bounds = array<i64: 1>, scalar_prefetch = 0 : i64, scratch_operands = 0 : i64, tpu.core_type = #tpu.core_type<tc>, window_params = [{transform_indices = @transform_0, window_bounds = array<i64: 8, 1>}, {transform_indices = @transform_1, window_bounds = array<i64: 8, 8>}, {transform_indices = @transform_2, window_bounds = array<i64: 8, 8>}, {transform_indices = @transform_3, window_bounds = array<i64: 8, 32>}, {transform_indices = @transform_4, window_bounds = array<i64: 8, 32>}, {transform_indices = @transform_5, window_bounds = array<i64: 8, 32>}, {pipeline_mode = #tpu.pipeline_mode<synchronous>, transform_indices = @transform_6, window_bounds = array<i64: 1, 3>}]} {
    %c0_i32 = arith.constant 0 : i32
    %0 = arith.cmpi eq, %arg0, %c0_i32 : i32
    %1 = arith.extui %0 : i1 to i32
    %c0_i32_0 = arith.constant 0 : i32
    %2 = arith.cmpi ne, %1, %c0_i32_0 : i32
    scf.if %2 {
      %cst_48 = arith.constant 0.000000e+00 : f32
      %147 = vector.broadcast %cst_48 : f32 to vector<1x3xf32>
      %c0_49 = arith.constant 0 : index
      %c0_50 = arith.constant 0 : index
      %148 = vector.load %arg7[%c0_49, %c0_50] : memref<1x3xf32, #tpu.memory_space<vmem>>, vector<1x3xf32>
      tpu.vector_store %arg7[%c0_49, %c0_50], %147 {strides = array<i32>} : memref<1x3xf32, #tpu.memory_space<vmem>>, vector<1x3xf32>,
    } else {
    }
    %c0 = arith.constant 0 : index
    %c0_1 = arith.constant 0 : index
    %3 = vector.load %arg1[%c0, %c0_1] : memref<8x1xi32, #tpu.memory_space<vmem>>, vector<8x1xi32>
    %4 = tpu.iota {dimensions = array<i32: 1>} : vector<8x8xi32>
    %5 = vector.broadcast %3 : vector<8x1xi32> to vector<8x8xi32>
    %6 = arith.cmpi eq, %4, %5 : vector<8x8xi32>
    %7 = arith.extui %6 : vector<8x8xi1> to vector<8x8xi32>
    %8 = arith.sitofp %7 : vector<8x8xi32> to vector<8x8xf32>
    %c0_2 = arith.constant 0 : index
    %c0_3 = arith.constant 0 : index
    %9 = vector.load %arg2[%c0_2, %c0_3] : memref<8x8xf32, #tpu.memory_space<vmem>>, vector<8x8xf32>
    %cst = arith.constant dense<0xFF800000> : vector<8xf32>
    %10 = vector.multi_reduction <maximumf>, %9, %cst [1] : vector<8x8xf32> to vector<8xf32>
    %11 = vector.shape_cast %10 : vector<8xf32> to vector<8x1xf32>
    %12 = vector.broadcast %11 : vector<8x1xf32> to vector<8x8xf32>
    %13 = arith.subf %9, %12 : vector<8x8xf32>
    %14 = math.exp %13 : vector<8x8xf32>
    %cst_4 = arith.constant dense<0.000000e+00> : vector<8xf32>
    %15 = vector.multi_reduction <add>, %14, %cst_4 [1] : vector<8x8xf32> to vector<8xf32>
    %16 = vector.shape_cast %15 : vector<8xf32> to vector<8x1xf32>
    %17 = math.log %16 : vector<8x1xf32>
    %18 = arith.addf %17, %11 : vector<8x1xf32>
    %19 = arith.mulf %8, %9 : vector<8x8xf32>
    %cst_5 = arith.constant dense<0.000000e+00> : vector<8xf32>
    %20 = vector.multi_reduction <add>, %19, %cst_5 [1] : vector<8x8xf32> to vector<8xf32>
    %21 = vector.shape_cast %20 : vector<8xf32> to vector<8x1xf32>
    %22 = arith.subf %18, %21 : vector<8x1xf32>
    %23 = arith.negf %9 : vector<8x8xf32>
    %24 = math.exp %23 : vector<8x8xf32>
    %cst_6 = arith.constant 1.000000e+00 : f32
    %25 = vector.broadcast %cst_6 : f32 to vector<8x8xf32>
    %26 = arith.addf %25, %24 : vector<8x8xf32>
    %27 = arith.divf %25, %26 : vector<8x8xf32>
    %28 = arith.subf %27, %8 : vector<8x8xf32>
    %29 = arith.mulf %28, %28 : vector<8x8xf32>
    %cst_7 = arith.constant dense<0.000000e+00> : vector<8xf32>
    %30 = vector.multi_reduction <add>, %29, %cst_7 [1] : vector<8x8xf32> to vector<8xf32>
    %31 = vector.shape_cast %30 : vector<8xf32> to vector<8x1xf32>
    %32 = arith.mulf %27, %27 : vector<8x8xf32>
    %33 = arith.addf %32, %8 : vector<8x8xf32>
    %cst_8 = arith.constant dense<0.000000e+00> : vector<8xf32>
    %34 = vector.multi_reduction <add>, %33, %cst_8 [1] : vector<8x8xf32> to vector<8xf32>
    %35 = vector.shape_cast %34 : vector<8xf32> to vector<8x1xf32>
    %36 = arith.divf %31, %35 : vector<8x1xf32>
    %37 = arith.addf %22, %36 : vector<8x1xf32>
    %c0_9 = arith.constant 0 : index
    %c0_10 = arith.constant 0 : index
    %38 = vector.load %arg3[%c0_9, %c0_10] : memref<8x8xf32, #tpu.memory_space<vmem>>, vector<8x8xf32>
    %cst_11 = arith.constant dense<0xFF800000> : vector<8xf32>
    %39 = vector.multi_reduction <maximumf>, %38, %cst_11 [1] : vector<8x8xf32> to vector<8xf32>
    %40 = vector.shape_cast %39 : vector<8xf32> to vector<8x1xf32>
    %41 = vector.broadcast %40 : vector<8x1xf32> to vector<8x8xf32>
    %42 = arith.subf %38, %41 : vector<8x8xf32>
    %43 = math.exp %42 : vector<8x8xf32>
    %cst_12 = arith.constant dense<0.000000e+00> : vector<8xf32>
    %44 = vector.multi_reduction <add>, %43, %cst_12 [1] : vector<8x8xf32> to vector<8xf32>
    %45 = vector.shape_cast %44 : vector<8xf32> to vector<8x1xf32>
    %46 = math.log %45 : vector<8x1xf32>
    %47 = arith.addf %46, %40 : vector<8x1xf32>
    %48 = arith.mulf %8, %38 : vector<8x8xf32>
    %cst_13 = arith.constant dense<0.000000e+00> : vector<8xf32>
    %49 = vector.multi_reduction <add>, %48, %cst_13 [1] : vector<8x8xf32> to vector<8xf32>
    %50 = vector.shape_cast %49 : vector<8xf32> to vector<8x1xf32>
    %51 = arith.subf %47, %50 : vector<8x1xf32>
    %52 = arith.negf %38 : vector<8x8xf32>
    %53 = math.exp %52 : vector<8x8xf32>
    %cst_14 = arith.constant 1.000000e+00 : f32
    %54 = vector.broadcast %cst_14 : f32 to vector<8x8xf32>
    %55 = arith.addf %54, %53 : vector<8x8xf32>
    %56 = arith.divf %54, %55 : vector<8x8xf32>
    %57 = arith.subf %56, %8 : vector<8x8xf32>
    %58 = arith.mulf %57, %57 : vector<8x8xf32>
    %cst_15 = arith.constant dense<0.000000e+00> : vector<8xf32>
    %59 = vector.multi_reduction <add>, %58, %cst_15 [1] : vector<8x8xf32> to vector<8xf32>
    %60 = vector.shape_cast %59 : vector<8xf32> to vector<8x1xf32>
    %61 = arith.mulf %56, %56 : vector<8x8xf32>
    %62 = arith.addf %61, %8 : vector<8x8xf32>
    %cst_16 = arith.constant dense<0.000000e+00> : vector<8xf32>
    %63 = vector.multi_reduction <add>, %62, %cst_16 [1] : vector<8x8xf32> to vector<8xf32>
    %64 = vector.shape_cast %63 : vector<8xf32> to vector<8x1xf32>
    %65 = arith.divf %60, %64 : vector<8x1xf32>
    %66 = arith.addf %51, %65 : vector<8x1xf32>
    %c0_17 = arith.constant 0 : index
    %c0_18 = arith.constant 0 : index
    %67 = vector.load %arg4[%c0_17, %c0_18] : memref<8x32xf32, #tpu.memory_space<vmem>>, vector<8x32xf32>
    %c0_19 = arith.constant 0 : index
    %c0_20 = arith.constant 0 : index
    %68 = vector.load %arg5[%c0_19, %c0_20] : memref<8x32xf32, #tpu.memory_space<vmem>>, vector<8x32xf32>
    %c0_21 = arith.constant 0 : index
    %c0_22 = arith.constant 0 : index
    %69 = vector.load %arg6[%c0_21, %c0_22] : memref<8x32xf32, #tpu.memory_space<vmem>>, vector<8x32xf32>
    %70 = arith.mulf %67, %67 : vector<8x32xf32>
    %cst_23 = arith.constant dense<0.000000e+00> : vector<8xf32>
    %71 = vector.multi_reduction <add>, %70, %cst_23 [1] : vector<8x32xf32> to vector<8xf32>
    %72 = vector.shape_cast %71 : vector<8xf32> to vector<8x1xf32>
    %cst_24 = arith.constant 1.000000e-16 : f32
    %73 = vector.broadcast %cst_24 : f32 to vector<8x1xf32>
    %74 = arith.maximumf %72, %73 : vector<8x1xf32>
    %75 = math.rsqrt %74 : vector<8x1xf32>
    %76 = arith.mulf %68, %68 : vector<8x32xf32>
    %cst_25 = arith.constant dense<0.000000e+00> : vector<8xf32>
    %77 = vector.multi_reduction <add>, %76, %cst_25 [1] : vector<8x32xf32> to vector<8xf32>
    %78 = vector.shape_cast %77 : vector<8xf32> to vector<8x1xf32>
    %cst_26 = arith.constant 1.000000e-16 : f32
    %79 = vector.broadcast %cst_26 : f32 to vector<8x1xf32>
    %80 = arith.maximumf %78, %79 : vector<8x1xf32>
    %81 = math.rsqrt %80 : vector<8x1xf32>
    %82 = arith.mulf %69, %69 : vector<8x32xf32>
    %cst_27 = arith.constant dense<0.000000e+00> : vector<8xf32>
    %83 = vector.multi_reduction <add>, %82, %cst_27 [1] : vector<8x32xf32> to vector<8xf32>
    %84 = vector.shape_cast %83 : vector<8xf32> to vector<8x1xf32>
    %cst_28 = arith.constant 1.000000e-16 : f32
    %85 = vector.broadcast %cst_28 : f32 to vector<8x1xf32>
    %86 = arith.maximumf %84, %85 : vector<8x1xf32>
    %87 = math.rsqrt %86 : vector<8x1xf32>
    %cst_29 = arith.constant 0.000000e+00 : f32
    %88 = vector.broadcast %cst_29 : f32 to vector<8x1xf32>
    %cst_30 = arith.constant 0.000000e+00 : f32
    %89 = vector.broadcast %cst_30 : f32 to vector<8x32xf32>
    %90 = arith.mulf %67, %68 : vector<8x32xf32>
    %cst_31 = arith.constant dense<0.000000e+00> : vector<8xf32>
    %91 = vector.multi_reduction <add>, %90, %cst_31 [1] : vector<8x32xf32> to vector<8xf32>
    %92 = vector.shape_cast %91 : vector<8xf32> to vector<8x1xf32>
    %93 = arith.mulf %92, %75 : vector<8x1xf32>
    %94 = arith.mulf %93, %81 : vector<8x1xf32>
    %cst_32 = arith.constant 1.000000e+00 : f32
    %95 = vector.broadcast %cst_32 : f32 to vector<8x1xf32>
    %96 = arith.subf %95, %94 : vector<8x1xf32>
    %97 = arith.addf %88, %96 : vector<8x1xf32>
    %98 = arith.subf %67, %68 : vector<8x32xf32>
    %99 = math.absf %98 : vector<8x32xf32>
    %100 = arith.addf %89, %99 : vector<8x32xf32>
    %101 = arith.mulf %68, %69 : vector<8x32xf32>
    %cst_33 = arith.constant dense<0.000000e+00> : vector<8xf32>
    %102 = vector.multi_reduction <add>, %101, %cst_33 [1] : vector<8x32xf32> to vector<8xf32>
    %103 = vector.shape_cast %102 : vector<8xf32> to vector<8x1xf32>
    %104 = arith.mulf %103, %81 : vector<8x1xf32>
    %105 = arith.mulf %104, %87 : vector<8x1xf32>
    %cst_34 = arith.constant 1.000000e+00 : f32
    %106 = vector.broadcast %cst_34 : f32 to vector<8x1xf32>
    %107 = arith.subf %106, %105 : vector<8x1xf32>
    %108 = arith.addf %97, %107 : vector<8x1xf32>
    %109 = arith.subf %67, %69 : vector<8x32xf32>
    %110 = math.absf %109 : vector<8x32xf32>
    %111 = arith.addf %100, %110 : vector<8x32xf32>
    %cst_35 = arith.constant dense<0.000000e+00> : vector<8xf32>
    %112 = vector.multi_reduction <add>, %111, %cst_35 [1] : vector<8x32xf32> to vector<8xf32>
    %113 = vector.shape_cast %112 : vector<8xf32> to vector<8x1xf32>
    %cst_36 = arith.constant 1.250000e-01 : f32
    %114 = vector.broadcast %cst_36 : f32 to vector<8x1xf32>
    %115 = arith.mulf %108, %114 : vector<8x1xf32>
    %cst_37 = arith.constant 3.906250e-03 : f32
    %116 = vector.broadcast %cst_37 : f32 to vector<8x1xf32>
    %117 = arith.mulf %113, %116 : vector<8x1xf32>
    %118 = arith.addf %115, %117 : vector<8x1xf32>
    %cst_38 = arith.constant 5.000000e-01 : f32
    %119 = vector.broadcast %cst_38 : f32 to vector<8x1xf32>
    %120 = arith.mulf %118, %119 : vector<8x1xf32>
    %121 = tpu.iota {dimensions = array<i32: 1>} : vector<8x3xi32>
    %cst_39 = arith.constant 0.000000e+00 : f32
    %122 = vector.broadcast %cst_39 : f32 to vector<8x3xf32>
    %c0_i32_40 = arith.constant 0 : i32
    %123 = vector.broadcast %c0_i32_40 : i32 to vector<8x3xi32>
    %124 = arith.cmpi eq, %121, %123 : vector<8x3xi32>
    %cst_41 = arith.constant 1.250000e-01 : f32
    %125 = vector.broadcast %cst_41 : f32 to vector<8x1xf32>
    %126 = arith.mulf %37, %125 : vector<8x1xf32>
    %127 = vector.shape_cast %126 : vector<8x1xf32> to vector<8x1xf32>
    %128 = vector.broadcast %127 : vector<8x1xf32> to vector<8x3xf32>
    %129 = arith.select %124, %128, %122 : vector<8x3xi1>, vector<8x3xf32>
    %c1_i32 = arith.constant 1 : i32
    %130 = vector.broadcast %c1_i32 : i32 to vector<8x3xi32>
    %131 = arith.cmpi eq, %121, %130 : vector<8x3xi32>
    %cst_42 = arith.constant 1.250000e-01 : f32
    %132 = vector.broadcast %cst_42 : f32 to vector<8x1xf32>
    %133 = arith.mulf %66, %132 : vector<8x1xf32>
    %134 = vector.shape_cast %133 : vector<8x1xf32> to vector<8x1xf32>
    %135 = vector.broadcast %134 : vector<8x1xf32> to vector<8x3xf32>
    %136 = arith.select %131, %135, %129 : vector<8x3xi1>, vector<8x3xf32>
    %c2_i32 = arith.constant 2 : i32
    %137 = vector.broadcast %c2_i32 : i32 to vector<8x3xi32>
    %138 = arith.cmpi eq, %121, %137 : vector<8x3xi32>
    %139 = vector.shape_cast %120 : vector<8x1xf32> to vector<8x1xf32>
    %140 = vector.broadcast %139 : vector<8x1xf32> to vector<8x3xf32>
    %141 = arith.select %138, %140, %136 : vector<8x3xi1>, vector<8x3xf32>
    %cst_43 = arith.constant dense<0.000000e+00> : vector<3xf32>
    %142 = vector.multi_reduction <add>, %141, %cst_43 [0] : vector<8x3xf32> to vector<3xf32>
    %143 = vector.shape_cast %142 : vector<3xf32> to vector<1x3xf32>
    %c0_44 = arith.constant 0 : index
    %c0_45 = arith.constant 0 : index
    %144 = vector.load %arg7[%c0_44, %c0_45] : memref<1x3xf32, #tpu.memory_space<vmem>>, vector<1x3xf32>
    %145 = arith.addf %144, %143 : vector<1x3xf32>
    %c0_46 = arith.constant 0 : index
    %c0_47 = arith.constant 0 : index
    %146 = vector.load %arg7[%c0_46, %c0_47] : memref<1x3xf32, #tpu.memory_space<vmem>>, vector<1x3xf32>
    tpu.vector_store %arg7[%c0_46, %c0_47], %145 {strides = array<i32>} : memref<1x3xf32, #tpu.memory_space<vmem>>, vector<1x3xf32>,
    return
  }
  func.func @transform_0(%arg0: i32) -> (i32, i32) {
    %c0_i32 = arith.constant 0 : i32
    %c0_i32_0 = arith.constant 0 : i32
    return %arg0, %c0_i32 : i32, i32
  }
  func.func @transform_1(%arg0: i32) -> (i32, i32) {
    %c0_i32 = arith.constant 0 : i32
    %c0_i32_0 = arith.constant 0 : i32
    return %arg0, %c0_i32 : i32, i32
  }
  func.func @transform_2(%arg0: i32) -> (i32, i32) {
    %c0_i32 = arith.constant 0 : i32
    %c0_i32_0 = arith.constant 0 : i32
    return %arg0, %c0_i32 : i32, i32
  }
  func.func @transform_3(%arg0: i32) -> (i32, i32) {
    %c0_i32 = arith.constant 0 : i32
    %c0_i32_0 = arith.constant 0 : i32
    return %arg0, %c0_i32 : i32, i32
  }
  func.func @transform_4(%arg0: i32) -> (i32, i32) {
    %c0_i32 = arith.constant 0 : i32
    %c0_i32_0 = arith.constant 0 : i32
    return %arg0, %c0_i32 : i32, i32
  }
  func.func @transform_5(%arg0: i32) -> (i32, i32) {
    %c0_i32 = arith.constant 0 : i32
    %c0_i32_0 = arith.constant 0 : i32
    return %arg0, %c0_i32 : i32, i32
  }
  func.func @transform_6(%arg0: i32) -> (i32, i32) {
    %c0_i32 = arith.constant 0 : i32
    %c0_i32_0 = arith.constant 0 : i32
    %c0_i32_1 = arith.constant 0 : i32
    return %c0_i32, %c0_i32_0 : i32, i32
  }
}

</mosaic_0001>

<bundles_post_ra>
// kernel: activity_criterion.1
= control target key start
LH: loop header
LB: loop body
LE: loop exit
PB: predicated region body
PF: predicated region fallthrough
CT: control target
= control target key end

     0   :  { %11 = vsyncpa [#allocation3], 0  ;;  %s417_s0 = inlined_call_operand.vmem [shape: s32[8,1], index: 0, kind: input, shape index: {}]   ;;  %s418_s1 = inlined_call_operand.vmem [shape: f32[8,8], index: 1, kind: input, shape index: {}]   ;;  %s419_s2 = inlined_call_operand.vmem [shape: f32[8,8], index: 2, kind: input, shape index: {}]   ;;  %s420_s3 = inlined_call_operand.hbm [shape: f32[8,32], index: 3, kind: input, shape index: {}]   ;;  %s421_s4 = inlined_call_operand.vmem [shape: f32[8,32], index: 4, kind: input, shape index: {}]   ;;  %s422_s5 = inlined_call_operand.hbm [shape: f32[8,32], index: 5, kind: input, shape index: {}]   ;;  %s423_s6 = inlined_call_operand.vmem [shape: f32[1,3], index: 6, kind: output, shape index: {}]  }
   0x1   :  { %12 = vsyncpa [#allocation5], 0  ;;  %s297_s21 = smov [#allocation2]   ;;  %s298_s23 = smov [#allocation4]  }
   0x2   :  { %s25_s22 = sshll.u32 %s297_s21, 4  ;;  %s37_s24 = sshll.u32 %s298_s23, 4  ;;  %s26_s22 = int_to_ptr.vmem [resolvable:$true] %s25_s22  ;;  %s38_s24 = int_to_ptr.vmem [resolvable:$true] %s37_s24 }
   0x3   :  { %s249_s27 = scalar_lea.hbm %s420_s3, 128 }
   0x4   :  { %p250_p0 = scmp.ne.s32.totalorder %s420_s3, %s249_s27  ;;  %p253_p1 = scmp.lt.u32.totalorder %s249_s27, %s420_s3 }
   0x6   :  { %p255_p2 = pnand %p253_p1, %p250_p0 }
   0x8   :  { %258 = shalt.err (!%p255_p2)
}
   0x9   :  { %s259_s8 = scalar_lea.vmem %s26_s22, 128  ;;  %p264_p4 = scmp.lt.s32.totalorder %s26_s22, %s26_s22 }
   0xa   :  { %p260_p3 = scmp.ne.s32.totalorder %s26_s22, %s259_s8  ;;  %p265_p5 = scmp.lt.s32.totalorder %s259_s8, %s259_s8 }
   0xc   :  { %p266_p6 = por %p265_p5, %p264_p4 }
   0xe   :  { %p267_p7 = pnand %p266_p6, %p260_p3 }
  0x10   :  { %270 = shalt.err (!%p267_p7)
}
  0x11   :  { %28 = dma.hbm_to_vmem [thread:$0]  %s420_s3, 128, %s26_s22, [#allocation3]  }
  0x12   :  { %s271_s13 = scalar_lea.hbm %s422_s5, 128 }
  0x13   :  { %p272_p8 = scmp.ne.s32.totalorder %s422_s5, %s271_s13  ;;  %p275_p9 = scmp.lt.u32.totalorder %s271_s13, %s422_s5 }
  0x15   :  { %p277_p10 = pnand %p275_p9, %p272_p8 }
  0x17   :  { %280 = shalt.err (!%p277_p10)
}
  0x18   :  { %s281_s18 = scalar_lea.vmem %s38_s24, 128  ;;  %p286_p12 = scmp.lt.s32.totalorder %s38_s24, %s38_s24 }
  0x19   :  { %p282_p11 = scmp.ne.s32.totalorder %s38_s24, %s281_s18  ;;  %p287_p13 = scmp.lt.s32.totalorder %s281_s18, %s281_s18 }
  0x1b   :  { %p288_p0 = por %p287_p13, %p286_p12 }
  0x1d   :  { %p289_p1 = pnand %p288_p0, %p282_p11 }
  0x1f   :  { %292 = shalt.err (!%p289_p1)
}
  0x20   :  { %40 = dma.hbm_to_vmem [thread:$0]  %s422_s5, 128, %s38_s24, [#allocation5]  }
  0x21   :  { %293 = dma.done.wait [#allocation3], 128  }
  0x22   :  { %294 = vsyncadd [#allocation3], 4294967168 }
  0x23   :  { %295 = dma.done.wait [#allocation5], 128  }
  0x24   :  { %296 = vsyncadd [#allocation5], 4294967168  ;;  %vm51_vm0 = vcmask 16384   ;;  %v299_v0 = vmov 0   ;;  %v300_v1 = vmov 0.0   ;;  %vm63_vm1 = vcmask 64512  }
  0x25   :  { %221 = vset.pattern.permute.xlu1 %v299_v0  ;;  %222 = vset.pattern.permute.xlu0 %v299_v0  ;;  %52 = vst.msk [vmem:[%s423_s6] sm:$0x1] %vm51_vm0, %v300_v1  ;;  %v367_v2 = vld [vmem:[%s418_s1] sm:$0xff]  ;;  %vm141_vm2 = vcmask 261120   ;;  %v139_v9 = vld [vmem:[#allocation4] sm:$0xff]  ;;  %v54_v32 = vlaneseq  ;;  %vm196_vm7 = vcmask 23552  }
  0x26   :  { %v372_v3 = vld [vmem:[%s419_s2] sm:$0xff]  ;;  %v64_v5 = vsel %vm63_vm1, %v367_v2, -inf  ;;  %v153_v11 = vmul.f32 %v139_v9, %v139_v9  ;;  %v215_v26 = vmul.f32 -1.442695, %v367_v2 }
  0x27   :  { %v53_v4 = vld [vmem:[%s417_s0] sm:$0xff]  ;;  %65 = vmax.xlane.f32.xlu0 %v64_v5  ;;  %v101_v7 = vsel %vm63_vm1, %v372_v3, -inf  ;;  %v216_v27 = vmul.f32 -1.442695, %v372_v3  ;;  %v392_v35 = vand.u32 127, %v54_v32 }
  0x28   :  { %57 = vperm.xlu1 %221, %v53_v4   ;;  %v138_v6 = vld [vmem:[%s421_s4] sm:$0xff]  ;;  %v154_v13 = vsel %vm141_vm2, %v153_v11, 0.0  ;;  %223 = vpow2.f32 %v215_v26 }
  0x29   :  { %v147_v8 = vmul.f32 %v138_v6, %v138_v6  ;;  %v137_v12 = vld [vmem:[#allocation2] sm:$0xff]  ;;  %v170_v18 = vmul.f32 %v139_v9, %v138_v6  ;;  %225 = vpow2.f32 %v216_v27  ;;  %vm188_vm4 = vcmp.eq.s32.totalorder %v392_v35, 0 }
  0x2a   :  { %v159_v14 = vmul.f32 %v138_v6, %v137_v12  ;;  %v140_v16 = vmul.f32 %v137_v12, %v137_v12  ;;  %v167_v20 = vsub.f32 %v137_v12, %v138_v6  ;;  %v178_v21 = vsub.f32 %v137_v12, %v139_v9 }
  0x2b   :  { %102 = vmax.xlane.f32.xlu0 %v101_v7  ;;  %v148_v10 = vsel %vm141_vm2, %v147_v8, 0.0  ;;  %v171_v19 = vsel %vm141_vm2, %v170_v18, 0.0  ;;  %vm191_vm5 = vcmp.eq.s32.totalorder %v392_v35, 1  ;;  %vm194_vm6 = vcmp.eq.s32.totalorder %v392_v35, 2 }
  0x2c   :  { %v160_v15 = vsel %vm141_vm2, %v159_v14, 0.0  ;;  %v142_v17 = vsel %vm141_vm2, %v140_v16, 0.0  ;;  %v168_v22 = vand.u32 2147483647, %v167_v20  ;;  %v179_v23 = vand.u32 2147483647, %v178_v21 }
  0x2e   :  { %v180_v24 = vadd.f32 %v179_v23, %v168_v22 }
  0x2f   :  { %149 = vadd.xlane.f32.xlu0 %v148_v10 }
  0x30   :  { %v181_v25 = vsel %vm141_vm2, %v180_v24, 0.0 }
  0x32   :  { %v224_v28 = vpop.eup %223 }
  0x33   :  { %155 = vadd.xlane.f32.xlu0 %v154_v13  ;;  %v226_v29 = vpop.eup %225  ;;  %v84_v30 = vadd.f32 1.0, %v224_v28 }
  0x34   :  { %v121_v31 = vadd.f32 1.0, %v226_v29 }
  0x35   :  { %227 = vrcp.f32 %v84_v30 }
  0x36   :  { %229 = vrcp.f32 %v121_v31 }
  0x37   :  { %161 = vadd.xlane.f32.xlu0 %v160_v15 }
  0x3f   :  { %v228_v33 = vpop.eup %227 }
  0x40   :  { %v230_v34 = vpop.eup %229  ;;  %v92_v36 = vmul.f32 %v228_v33, %v228_v33 }
  0x41   :  { %v129_v37 = vmul.f32 %v230_v34, %v230_v34 }
  0x4c   :  { %143 = vadd.xlane.f32.xlu1 %v142_v17 }
  0xa7   :  { %v58_v38 = vpop.permute.xlu1 %57 }
  0xa8   :  { %vm59_vm3 = vcmp.eq.s32.totalorder %v392_v35, %v58_v38 }
  0xa9   :  { %v214_v39 = vsel %vm59_vm3, 1.0, %v300_v1 }
  0xaa   :  { %v93_v40 = vadd.f32 %v214_v39, %v92_v36  ;;  %v130_v41 = vadd.f32 %v214_v39, %v129_v37  ;;  %v87_v42 = vsub.f32 %v228_v33, %v214_v39  ;;  %v124_v43 = vsub.f32 %v230_v34, %v214_v39 }
  0xab   :  { %v76_v60 = vmul.f32 %v214_v39, %v367_v2  ;;  %v113_v62 = vmul.f32 %v214_v39, %v372_v3 }
  0xac   :  { %v94_v44 = vsel %vm63_vm1, %v93_v40, 0.0  ;;  %v88_v45 = vmul.f32 %v87_v42, %v87_v42  ;;  %v125_v46 = vmul.f32 %v124_v43, %v124_v43  ;;  %v131_v47 = vsel %vm63_vm1, %v130_v41, 0.0 }
  0xad   :  { %95 = vadd.xlane.f32.xlu0 %v94_v44  ;;  %v77_v61 = vsel %vm63_vm1, %v76_v60, 0.0  ;;  %v114_v63 = vsel %vm63_vm1, %v113_v62, 0.0 }
  0xae   :  { %v89_v48 = vsel %vm63_vm1, %v88_v45, 0.0  ;;  %v126_v49 = vsel %vm63_vm1, %v125_v46, 0.0 }
  0xaf   :  { %90 = vadd.xlane.f32.xlu1 %v89_v48 }
  0xb1   :  { %132 = vadd.xlane.f32.xlu0 %v131_v47 }
  0xb3   :  { %127 = vadd.xlane.f32.xlu1 %v126_v49 }
  0xb4   :  { %v66_v50 = vpop.xlane.xlu0 %65 }
  0xb5   :  { %v67_v51 = vsub.f32 %v367_v2, %v66_v50 }
  0xb7   :  { %v68_v52 = vmul.f32 1.442695, %v67_v51 }
  0xb8   :  { %v103_v53 = vpop.xlane.xlu0 %102 }
  0xb9   :  { %231 = vpow2.f32 %v68_v52  ;;  %v104_v54 = vsub.f32 %v372_v3, %v103_v53 }
  0xbb   :  { %v105_v55 = vmul.f32 1.442695, %v104_v54 }
  0xbc   :  { %v150_v0 = vpop.xlane.xlu0 %149 }
  0xbd   :  { %233 = vpow2.f32 %v105_v55  ;;  %v151_v8 = vmax.f32 %v150_v0, 1e-16 }
  0xc0   :  { %v156_v1 = vpop.xlane.xlu0 %155 }
  0xc1   :  { %v157_v9 = vmax.f32 %v156_v1, 1e-16 }
  0xc3   :  { %v232_v56 = vpop.eup %231 }
  0xc4   :  { %v70_v57 = vsel %vm63_vm1, %v232_v56, 0.0  ;;  %v162_v4 = vpop.xlane.xlu0 %161 }
  0xc5   :  { %71 = vadd.xlane.f32.xlu0 %v70_v57  ;;  %v204_v57 = vld [vmem:[%s423_s6] sm:$0x1] }
  0xc7   :  { %v234_v58 = vpop.eup %233 }
  0xc8   :  { %v107_v59 = vsel %vm63_vm1, %v234_v58, 0.0 }
  0xc9   :  { %108 = vadd.xlane.f32.xlu0 %v107_v59 }
  0xcd   :  { %172 = vadd.xlane.f32.xlu0 %v171_v19 }
  0xd1   :  { %78 = vadd.xlane.f32.xlu0 %v77_v61 }
  0xd5   :  { %115 = vadd.xlane.f32.xlu0 %v114_v63 }
  0xd9   :  { %182 = vadd.xlane.f32.xlu0 %v181_v25  ;;  %v144_v5 = vpop.xlane.xlu1 %143 }
  0xda   :  { %v145_v6 = vmax.f32 %v144_v5, 1e-16 }
  0xdc   :  { %235 = vrsqrt.f32 %v145_v6 }
  0xdd   :  { %237 = vrsqrt.f32 %v151_v8 }
  0xde   :  { %239 = vrsqrt.f32 %v157_v9 }
  0xe6   :  { %v236_v3 = vpop.eup %235 }
  0xe7   :  { %v163_v12 = vmul.f32 %v236_v3, %v162_v4  ;;  %v238_v13 = vpop.eup %237 }
  0xe8   :  { %v240_v16 = vpop.eup %239 }
  0xe9   :  { %v164_v20 = vmul.f32 %v238_v13, %v163_v12 }
  0xeb   :  { %v165_v27 = vsub.f32 1.0, %v164_v20 }
 0x13a   :  { %v96_v7 = vpop.xlane.xlu0 %95 }
 0x13c   :  { %v91_v18 = vpop.xlane.xlu1 %90 }
 0x13e   :  { %v133_v2 = vpop.xlane.xlu0 %132 }
 0x140   :  { %v128_v33 = vpop.xlane.xlu1 %127 }
 0x152   :  { %v72_v10 = vpop.xlane.xlu0 %71 }
 0x153   :  { %241 = vlog2.f32 %v72_v10 }
 0x154   :  { %243 = vrcp.f32 %v96_v7 }
 0x156   :  { %v109_v11 = vpop.xlane.xlu0 %108 }
 0x157   :  { %245 = vlog2.f32 %v109_v11 }
 0x158   :  { %247 = vrcp.f32 %v133_v2 }
 0x15a   :  { %v173_v14 = vpop.xlane.xlu0 %172 }
 0x15b   :  { %v174_v15 = vmul.f32 %v238_v13, %v173_v14 }
 0x15d   :  { %v242_v17 = vpop.eup %241  ;;  %v175_v19 = vmul.f32 %v240_v16, %v174_v15 }
 0x15e   :  { %v74_v21 = vmul.f32 0.6931472, %v242_v17  ;;  %v79_v22 = vpop.xlane.xlu0 %78  ;;  %v244_v23 = vpop.eup %243 }
 0x15f   :  { %v176_v24 = vsub.f32 1.0, %v175_v19  ;;  %v98_v28 = vmul.f32 %v244_v23, %v91_v18 }
 0x160   :  { %v75_v25 = vadd.f32 %v74_v21, %v66_v50 }
 0x161   :  { %v246_v26 = vpop.eup %245  ;;  %v177_v34 = vadd.f32 %v176_v24, %v165_v27 }
 0x162   :  { %v111_v29 = vmul.f32 0.6931472, %v246_v26  ;;  %v80_v30 = vsub.f32 %v75_v25, %v79_v22  ;;  %v116_v31 = vpop.xlane.xlu0 %115  ;;  %v248_v32 = vpop.eup %247 }
 0x163   :  { %v135_v38 = vmul.f32 %v248_v32, %v128_v33  ;;  %v184_v42 = vmul.f32 0.125, %v177_v34 }
 0x164   :  { %v99_v36 = vadd.f32 %v98_v28, %v80_v30  ;;  %v112_v37 = vadd.f32 %v111_v29, %v103_v53 }
 0x166   :  { %v117_v39 = vsub.f32 %v112_v37, %v116_v31  ;;  %v183_v40 = vpop.xlane.xlu0 %182  ;;  %v189_v41 = vmul.f32 0.125, %v99_v36 }
 0x167   :  { %v185_v43 = vmul.f32 0.00390625, %v183_v40 }
 0x168   :  { %v136_v44 = vadd.f32 %v135_v38, %v117_v39  ;;  %v190_v47 = vsel %vm188_vm4, %v189_v41, 0.0 }
 0x169   :  { %v186_v45 = vadd.f32 %v185_v43, %v184_v42 }
 0x16a   :  { %v192_v46 = vmul.f32 0.125, %v136_v44 }
 0x16b   :  { %v187_v48 = vmul.f32 0.5, %v186_v45 }
 0x16c   :  { %v193_v49 = vsel %vm191_vm5, %v192_v46, %v190_v47 }
 0x16d   :  { %v195_v50 = vsel %vm194_vm6, %v187_v48, %v193_v49 }
 0x16e   :  { %v197_v51 = vsel %vm196_vm7, %v195_v50, 0.0 }
 0x16f   :  { %v198_v52 = vrot.slane %v197_v51, 4 }
 0x171   :  { %v199_v53 = vadd.f32 %v198_v52, %v197_v51 }
 0x173   :  { %v200_v54 = vrot.slane %v199_v53, 2 }
 0x175   :  { %v201_v55 = vadd.f32 %v200_v54, %v199_v53 }
 0x177   :  { %v202_v56 = vrot.slane %v201_v55, 1 }
 0x179   :  { %v203_v58 = vadd.f32 %v202_v56, %v201_v55 }
 0x17b   :  { %v205_v59 = vadd.f32 %v204_v57, %v203_v58 }
 0x17d   :  { %207 = vst.msk [vmem:[%s423_s6] sm:$0x1] %vm51_vm0, %v205_v59 }
 0x17e   :  { %212 = vsyncpa [#allocation3], 1 }
 0x17f   :  { %213 = vsyncpa [#allocation5], 1 }

</bundles_post_ra>
